<compile_context>
chip_gen: v7x
topology: tpu7x:2x2x1
jax: 0.10.0
libtpu: 0.0.40
codegen_flags: <defaults>
</compile_context>

<pallas_src>
import functools

import jax
import jax.numpy as jnp
from jax.experimental import pallas as pl
from jax.experimental.pallas import tpu as pltpu


def _round_up(x, m):
    return ((x + m - 1) // m) * m


def _cdiv(a, b):
    return -(-a // b)


def _balanced_tile(dim, max_tile, align):
    """Tile <= max_tile (multiple of `align`) with balanced blocks.

    Returns (tile, padded_dim) with padded_dim % tile == 0 and minimal padding.
    """
    d = _round_up(dim, align)
    t = min(_round_up(max_tile, align), d)
    nb = _cdiv(d, t)
    t = _round_up(_cdiv(d, nb), align)
    return t, t * nb


def _linear_kernel(x_ref, w_ref, b_ref, o_ref, *, precision):
    k = pl.program_id(2)

    # Initialize the resident output tile with the broadcast bias at the first
    # K step — no scratch accumulator, no finalize copy.
    @pl.when(k == 0)
    def _():
        o_ref[...] = jnp.broadcast_to(b_ref[...], o_ref.shape)

    # Accumulate directly into the f32 output tile; block index (i, j) is
    # invariant over k, so the tile stays in VMEM across the whole reduction.
    o_ref[...] += jnp.dot(
        x_ref[...],
        w_ref[...],
        preferred_element_type=jnp.float32,
        precision=precision,
    )


def fp32_linear(
    x,
    weight,
    bias,
    *,
    tm=None,
    tn=None,
    tk=None,
    precision=jax.lax.Precision.HIGHEST,
):
    """y = x @ weight + bias  (weight: [in, out], bias: [out])."""
    orig_shape = x.shape
    in_features, out_features = weight.shape

    x2d = x.reshape(-1, in_features).astype(jnp.float32)
    m = x2d.shape[0]
    w = weight.astype(jnp.float32)
    b = bias.astype(jnp.float32)

    # ---- tile selection: lane-dense, (8,128)-aligned, VMEM-budgeted --------
    VMEM_BUDGET = 32 << 20  # double-buffer budget; safe on v7x (64 MiB phys.)
    TM_CAP = 2048           # amortize per-step overhead without blowing VMEM

    tk, k_pad = _balanced_tile(in_features, tk if tk else 512, 128)
    tn, n_pad = _balanced_tile(out_features, tn if tn else 512, 128)

    if tm is None:
        fixed = 8 * tk * tn + 8 * tn        # double-buffered W tile + bias
        per_row = 8 * (tk + tn)             # double-buffered x row + out row
        tm_cap = max(8, min(TM_CAP, (VMEM_BUDGET - fixed) // per_row))
    else:
        tm_cap = tm
    tm, m_pad = _balanced_tile(m, tm_cap, 8)

    # v7x has 2 TensorCores: if both parallel axes collapse to one block,
    # split N so the grid actually shards (harmless on v5e/v6e).
    if m_pad // tm == 1 and n_pad // tn == 1 and n_pad >= 256 and n_pad % 256 == 0:
        tn = n_pad // 2

    # ---- padding: statically skipped when shapes are already aligned -------
    # Only the K axis strictly needs zero fill for correctness; M/N pads just
    # give aligned tiles and are sliced off below.
    if (m_pad, k_pad) != (m, in_features):
        x2d = jnp.pad(x2d, ((0, m_pad - m), (0, k_pad - in_features)))
    if (k_pad, n_pad) != (in_features, out_features):
        # NOTE: for repeated calls with a fixed weight, pre-pad weight/bias
        # once outside the hot path to avoid re-streaming them through HBM.
        w = jnp.pad(w, ((0, k_pad - in_features), (0, n_pad - out_features)))
    if n_pad != out_features:
        b = jnp.pad(b, (0, n_pad - out_features))
    b2d = b.reshape(1, n_pad)

    grid = (m_pad // tm, n_pad // tn, k_pad // tk)

    # fp32 on the MXU is multi-pass bf16: ~6 passes HIGHEST, ~3 HIGH.
    pass_factor = {
        jax.lax.Precision.DEFAULT: 1,
        jax.lax.Precision.HIGH: 3,
        jax.lax.Precision.HIGHEST: 6,
    }.get(precision, 6)

    vmem_bytes = 8 * (tm * tk + tk * tn + tm * tn + tn)  # 2 buffers x 4 B each
    vmem_limit = max(int(vmem_bytes) + (4 << 20), 32 << 20)

    out = pl.pallas_call(
        functools.partial(_linear_kernel, precision=precision),
        out_shape=jax.ShapeDtypeStruct((m_pad, n_pad), jnp.float32),
        grid_spec=pltpu.PrefetchScalarGridSpec(
            num_scalar_prefetch=0,
            grid=grid,
            in_specs=[
                pl.BlockSpec((tm, tk), lambda i, j, k: (i, k)),   # x tile
                pl.BlockSpec((tk, tn), lambda i, j, k: (k, j)),   # W tile
                pl.BlockSpec((1, tn), lambda i, j, k: (0, j)),    # bias tile
            ],
            out_specs=pl.BlockSpec((tm, tn), lambda i, j, k: (i, j)),
        ),
        compiler_params=pltpu.CompilerParams(
            dimension_semantics=("parallel", "parallel", "arbitrary"),
            vmem_limit_bytes=vmem_limit,
        ),
        cost_estimate=pl.CostEstimate(
            flops=2 * m * in_features * out_features * pass_factor,
            transcendentals=0,
            bytes_accessed=4
            * (
                m_pad * k_pad * (n_pad // tn)    # x re-read once per N block
                + k_pad * n_pad * (m_pad // tm)  # W re-read once per M block
                + m_pad * n_pad                  # output written once
            ),
        ),
    )(x2d, w, b2d)

    out = out[:m, :out_features]
    return out.reshape(*orig_shape[:-1], out_features)


if __name__ == "__main__":
    key = jax.random.PRNGKey(0)
    batch, in_features, out_features = 8, 32, 32

    kx, kw = jax.random.split(key)
    x = jax.random.normal(kx, (batch, in_features), dtype=jnp.float32)
    # Deterministic init mirroring the module: weight ~ randn(in, out), bias = zeros(out)
    weight = jax.random.normal(kw, (in_features, out_features), dtype=jnp.float32)
    bias = jnp.zeros((out_features,), dtype=jnp.float32)

    y = fp32_linear(x, weight, bias)
    jax.block_until_ready(y)

    # Reference check (x @ W + b) at full fp32 precision.
    y_ref = jnp.dot(x, weight, precision=jax.lax.Precision.HIGHEST) + bias
    assert y.shape == (batch, out_features)
    assert jnp.allclose(y, y_ref, atol=1e-4, rtol=1e-5), "mismatch vs reference"

    print("KERNEL_OK")
</pallas_src>

<mosaic_0001>
module attributes {stable_mosaic.version = 11 : i64} {
  func.func @_linear_kernel(%arg0: i32, %arg1: i32, %arg2: i32, %arg3: memref<8x128xf32, #tpu.memory_space<vmem>>, %arg4: memref<128x128xf32, #tpu.memory_space<vmem>>, %arg5: memref<1x128xf32, #tpu.memory_space<vmem>>, %arg6: memref<8x128xf32, #tpu.memory_space<vmem>>) attributes {dimension_semantics = [#tpu.dimension_semantics<parallel>, #tpu.dimension_semantics<parallel>, #tpu.dimension_semantics<arbitrary>], iteration_bounds = array<i64: 1, 1, 1>, scalar_prefetch = 0 : i64, scratch_operands = 0 : i64, tpu.core_type = #tpu.core_type<tc>, window_params = [{transform_indices = @transform_0, window_bounds = array<i64: 8, 128>}, {transform_indices = @transform_1, window_bounds = array<i64: 128, 128>}, {transform_indices = @transform_2, window_bounds = array<i64: 1, 128>}, {transform_indices = @transform_3, window_bounds = array<i64: 8, 128>}]} {
    %c0_i32 = arith.constant 0 : i32
    %0 = arith.cmpi eq, %arg2, %c0_i32 : i32
    %1 = arith.extui %0 : i1 to i32
    %c0_i32_0 = arith.constant 0 : i32
    %2 = arith.cmpi ne, %1, %c0_i32_0 : i32
    scf.if %2 {
      %c0_8 = arith.constant 0 : index
      %c0_9 = arith.constant 0 : index
      %9 = vector.load %arg5[%c0_8, %c0_9] : memref<1x128xf32, #tpu.memory_space<vmem>>, vector<1x128xf32>
      %10 = vector.shape_cast %9 : vector<1x128xf32> to vector<1x128xf32>
      %11 = vector.broadcast %10 : vector<1x128xf32> to vector<8x128xf32>
      %c0_10 = arith.constant 0 : index
      %c0_11 = arith.constant 0 : index
      %12 = vector.load %arg6[%c0_10, %c0_11] : memref<8x128xf32, #tpu.memory_space<vmem>>, vector<8x128xf32>
      tpu.vector_store %arg6[%c0_10, %c0_11], %11 {strides = array<i32>} : memref<8x128xf32, #tpu.memory_space<vmem>>, vector<8x128xf32>,
    } else {
    }
    %c0 = arith.constant 0 : index
    %c0_1 = arith.constant 0 : index
    %3 = vector.load %arg6[%c0, %c0_1] : memref<8x128xf32, #tpu.memory_space<vmem>>, vector<8x128xf32>
    %c0_2 = arith.constant 0 : index
    %c0_3 = arith.constant 0 : index
    %4 = vector.load %arg3[%c0_2, %c0_3] : memref<8x128xf32, #tpu.memory_space<vmem>>, vector<8x128xf32>
    %c0_4 = arith.constant 0 : index
    %c0_5 = arith.constant 0 : index
    %5 = vector.load %arg4[%c0_4, %c0_5] : memref<128x128xf32, #tpu.memory_space<vmem>>, vector<128x128xf32>
    %cst = arith.constant dense<0.000000e+00> : vector<8x128xf32>
    %6 = tpu.matmul %4, %5, %cst {dimension_numbers = #tpu.dot_dimension_numbers<[1], [0], [0], [1], [0, 0, 1, 1], [], []>, precision = #tpu.contract_precision<fp32>} : vector<8x128xf32>, vector<128x128xf32>, vector<8x128xf32> -> vector<8x128xf32>
    %7 = arith.addf %3, %6 : vector<8x128xf32>
    %c0_6 = arith.constant 0 : index
    %c0_7 = arith.constant 0 : index
    %8 = vector.load %arg6[%c0_6, %c0_7] : memref<8x128xf32, #tpu.memory_space<vmem>>, vector<8x128xf32>
    tpu.vector_store %arg6[%c0_6, %c0_7], %7 {strides = array<i32>} : memref<8x128xf32, #tpu.memory_space<vmem>>, vector<8x128xf32>,
    return
  }
  func.func @transform_0(%arg0: i32, %arg1: i32, %arg2: i32) -> (i32, i32) {
    %c0_i32 = arith.constant 0 : i32
    return %arg0, %arg2 : i32, i32
  }
  func.func @transform_1(%arg0: i32, %arg1: i32, %arg2: i32) -> (i32, i32) {
    %c0_i32 = arith.constant 0 : i32
    return %arg2, %arg1 : i32, i32
  }
  func.func @transform_2(%arg0: i32, %arg1: i32, %arg2: i32) -> (i32, i32) {
    %c0_i32 = arith.constant 0 : i32
    %c0_i32_0 = arith.constant 0 : i32
    return %c0_i32, %arg1 : i32, i32
  }
  func.func @transform_3(%arg0: i32, %arg1: i32, %arg2: i32) -> (i32, i32) {
    %c0_i32 = arith.constant 0 : i32
    return %arg0, %arg1 : i32, i32
  }
}

</mosaic_0001>

<bundles_post_ra>
// kernel: tpu_custom_call.1
= control target key start
LH: loop header
LB: loop body
LE: loop exit
PB: predicated region body
PF: predicated region fallthrough
CT: control target
= control target key end

     0   :  { %8 = vsyncpa [#allocation3], 0  ;;  %s1600_s0 = inlined_call_operand.hbm [shape: f32[8,128], index: 0, kind: input, shape index: {}]   ;;  %s1601_s1 = inlined_call_operand.hbm [shape: f32[128,128], index: 1, kind: input, shape index: {}]   ;;  %s1602_s2 = inlined_call_operand.vmem [shape: f32[1,128], index: 2, kind: input, shape index: {}]   ;;  %s1603_s3 = inlined_call_operand.hbm [shape: f32[8,128], index: 3, kind: output, shape index: {}]  }
   0x1   :  { %9 = vsyncpa [#allocation6], 0 }
   0x2   :  { %10 = vsyncpa [#allocation4], 0  ;;  %s1267_s12 = smov [#allocation2]   ;;  %s1268_s14 = smov [#allocation5]  }
   0x3   :  { %s17_s13 = sshll.u32 %s1267_s12, 4  ;;  %s26_s15 = sshll.u32 %s1268_s14, 4  ;;  %s18_s13 = int_to_ptr.vmem [resolvable:$true] %s17_s13  ;;  %s1295_s15 = int_to_ptr.vmem [resolvable:$true] %s26_s15 }
   0x4   :  { %s1195_s18 = scalar_lea.hbm %s1600_s0, 128 }
   0x5   :  { %p1196_p0 = scmp.ne.s32.totalorder %s1600_s0, %s1195_s18  ;;  %p1199_p1 = scmp.lt.u32.totalorder %s1195_s18, %s1600_s0 }
   0x7   :  { %p1201_p2 = pnand %p1199_p1, %p1196_p0 }
   0x9   :  { %1204 = shalt.err (!%p1201_p2)
}
   0xa   :  { %s1205_s23 = scalar_lea.vmem %s18_s13, 128  ;;  %p1210_p4 = scmp.lt.s32.totalorder %s18_s13, %s18_s13 }
   0xb   :  { %p1206_p3 = scmp.ne.s32.totalorder %s18_s13, %s1205_s23  ;;  %p1211_p5 = scmp.lt.s32.totalorder %s1205_s23, %s1205_s23 }
   0xd   :  { %p1212_p6 = por %p1211_p5, %p1210_p4 }
   0xf   :  { %p1213_p7 = pnand %p1212_p6, %p1206_p3 }
  0x11   :  { %1216 = shalt.err (!%p1213_p7)
}
  0x12   :  { %20 = dma.hbm_to_vmem [thread:$0]  %s1600_s0, 128, %s18_s13, [#allocation3]  }
  0x13   :  { %s1217_s28 = scalar_lea.hbm %s1601_s1, 2048 }
  0x14   :  { %p1218_p8 = scmp.ne.s32.totalorder %s1601_s1, %s1217_s28  ;;  %p1221_p9 = scmp.lt.u32.totalorder %s1217_s28, %s1601_s1 }
  0x16   :  { %p1223_p10 = pnand %p1221_p9, %p1218_p8 }
  0x18   :  { %1226 = shalt.err (!%p1223_p10)
}
  0x19   :  { %s1227_s6 = scalar_lea.vmem %s1295_s15, 2048  ;;  %p1232_p12 = scmp.lt.s32.totalorder %s1295_s15, %s1295_s15 }
  0x1a   :  { %p1228_p11 = scmp.ne.s32.totalorder %s1295_s15, %s1227_s6  ;;  %p1233_p13 = scmp.lt.s32.totalorder %s1227_s6, %s1227_s6 }
  0x1c   :  { %p1234_p0 = por %p1233_p13, %p1232_p12 }
  0x1e   :  { %p1235_p1 = pnand %p1234_p0, %p1228_p11 }
  0x20   :  { %1238 = shalt.err (!%p1235_p1)
}
  0x21   :  { %s1269_s0 = smov 128   ;;  %s1270_s7 = smov 8  }
  0x22   :  { %32 = dma.hbm_to_vmem [thread:$0]  %s1601_s1, 2048, %s1295_s15, [#allocation6], %s1269_s0, %s1269_s0, %s1270_s7  }
  0x23   :  { %1261 = dma.done.wait [#allocation3], 128  }
  0x24   :  { %1262 = vsyncadd [#allocation3], 4294967168 }
  0x25   :  { %1263 = dma.done.wait [#allocation6], 2048  }
  0x26   :  { %1264 = vsyncadd [#allocation6], 4294965248  ;;  %v1271_v0 = vmov 0.0|0.0   ;;  %vm1272_vm0 = vmmov 0   ;;  %v1273_v1 = vmov 0.0   ;;  %v55_v2 = vld [vmem:[#allocation5] sm:$0xff] }
  0x27   :  { %1043 = vmatprep.subr.bf16.mxu0 %v1271_v0  ;;  %1067 = vmatprep.subr.bf16.mxu1 %v1271_v0  ;;  %v56_v3 = vld [vmem:[#allocation5 + $0x8] sm:$0xff]  ;;  %v57_v4 = vld [vmem:[#allocation5 + $0x10] sm:$0xff]  ;;  %v72_v5 = vand.u32 4294901760, %v55_v2  ;;  %v58_v7 = vld [vmem:[#allocation5 + $0x18] sm:$0xff]  ;;  %s1274_s11 = smov [#allocation7]  }
  0x28   :  { %865 = vmatprep.mubr.msk.f32.mxu0 %vm1272_vm0, %v1273_v1  ;;  %900 = vmatprep.mubr.msk.f32.mxu1 %vm1272_vm0, %v1273_v1  ;;  %v75_v6 = vand.u32 4294901760, %v56_v3  ;;  %v78_v8 = vand.u32 4294901760, %v57_v4  ;;  %v59_v9 = vld [vmem:[#allocation5 + $0x20] sm:$0xff]  ;;  %v60_v10 = vld [vmem:[#allocation5 + $0x28] sm:$0xff]  ;;  %v81_v11 = vand.u32 4294901760, %v58_v7  ;;  %v61_v14 = vld [vmem:[#allocation5 + $0x30] sm:$0xff] }
  0x29   :  { %v84_v12 = vand.u32 4294901760, %v59_v9  ;;  %v87_v13 = vand.u32 4294901760, %v60_v10  ;;  %v1334_v16 = vsub.f32 %v55_v2, %v72_v5  ;;  %v62_v19 = vld [vmem:[#allocation5 + $0x38] sm:$0xff]  ;;  %v63_v20 = vld [vmem:[#allocation5 + $0x40] sm:$0xff]  ;;  %v90_v26 = vand.u32 4294901760, %v61_v14  ;;  %v64_v27 = vld [vmem:[#allocation5 + $0x48] sm:$0xff] }
  0x2a   :  { %v1332_v15 = vpack.c.bf16 %v75_v6, %v72_v5  ;;  %v1336_v17 = vsub.f32 %v56_v3, %v75_v6  ;;  %v1338_v18 = vsub.f32 %v57_v4, %v78_v8  ;;  %v1340_v21 = vpack.c.bf16 %v81_v11, %v78_v8  ;;  %v65_v40 = vld [vmem:[#allocation5 + $0x50] sm:$0xff]  ;;  %v66_v41 = vld [vmem:[#allocation5 + $0x58] sm:$0xff]  ;;  %v67_v50 = vld [vmem:[#allocation5 + $0x60] sm:$0xff]  ;;  %s720_s12 = sshll.u32 %s1274_s11, 4  ;;  %s721_s12 = int_to_ptr.vmem [resolvable:$true] %s720_s12 }
  0x2b   :  { %v1342_v22 = vsub.f32 %v58_v7, %v81_v11  ;;  %v1345_v23 = vsub.f32 %v59_v9, %v84_v12  ;;  %v165_v24 = vand.u32 4294901760, %v1334_v16  ;;  %v93_v28 = vand.u32 4294901760, %v62_v19  ;;  %v68_v59 = vld [vmem:[#allocation5 + $0x68] sm:$0xff]  ;;  %v69_v2 = vld [vmem:[#allocation5 + $0x70] sm:$0xff]  ;;  %v70_v7 = vld [vmem:[#allocation5 + $0x78] sm:$0xff]  ;;  %s1239_s13 = scalar_lea.vmem %s721_s12, 128  ;;  %p1244_p3 = scmp.lt.s32.totalorder %s721_s12, %s721_s12 }
  0x2c   :  { %1045 = vmatpush3.bf16.msra.mxu0 %v1332_v15  ;;  %v172_v25 = vand.u32 4294901760, %v1336_v17  ;;  %v179_v29 = vand.u32 4294901760, %v1338_v18  ;;  %v96_v31 = vand.u32 4294901760, %v63_v20  ;;  %v1352_v32 = vsub.f32 %v60_v10, %v87_v13  ;;  %p1240_p2 = scmp.ne.s32.totalorder %s721_s12, %s1239_s13  ;;  %p1245_p4 = scmp.lt.s32.totalorder %s1239_s13, %s1239_s13 }
  0x2d   :  { %1046 = vmatprep.subr.bf16.mxu0 %v1271_v0  ;;  %v186_v30 = vand.u32 4294901760, %v1342_v22  ;;  %v166_v33 = vsub.f32 %v1334_v16, %v165_v24  ;;  %v1360_v35 = vsub.f32 %v61_v14, %v90_v26  ;;  %v1362_v36 = vsub.f32 %v62_v19, %v93_v28 }
  0x2e   :  { %v173_v34 = vsub.f32 %v1336_v17, %v172_v25  ;;  %v180_v37 = vsub.f32 %v1338_v18, %v179_v29  ;;  %v99_v39 = vand.u32 4294901760, %v64_v27  ;;  %v1371_v42 = vpack.c.bf16 %v87_v13, %v84_v12  ;;  %p1246_p5 = por %p1245_p4, %p1244_p3 }
  0x2f   :  { %v187_v38 = vsub.f32 %v1342_v22, %v186_v30  ;;  %v167_v43 = vand.u32 4294901760, %v166_v33  ;;  %v1373_v45 = vpack.c.bf16 %v93_v28, %v90_v26  ;;  %v1376_v48 = vsub.f32 %v63_v20, %v96_v31 }
  0x30   :  { %1048 = vmatpush3.bf16.msra.mxu0 %v1340_v21  ;;  %v174_v44 = vand.u32 4294901760, %v173_v34  ;;  %v181_v46 = vand.u32 4294901760, %v180_v37  ;;  %v193_v49 = vand.u32 4294901760, %v1345_v23  ;;  %v200_v52 = vand.u32 4294901760, %v1352_v32  ;;  %p1247_p6 = pnand %p1246_p5, %p1240_p2 }
  0x31   :  { %1049 = vmatprep.subr.bf16.mxu0 %v1271_v0  ;;  %v188_v47 = vand.u32 4294901760, %v187_v38  ;;  %v102_v53 = vand.u32 4294901760, %v65_v40  ;;  %v105_v54 = vand.u32 4294901760, %v66_v41  ;;  %v1380_v55 = vsub.f32 %v64_v27, %v99_v39 }
  0x32   :  { %v1068_v51 = vpack.c.bf16 %v174_v44, %v167_v43  ;;  %v194_v56 = vsub.f32 %v1345_v23, %v193_v49  ;;  %v207_v57 = vand.u32 4294901760, %v1360_v35  ;;  %v214_v58 = vand.u32 4294901760, %v1362_v36 }
  0x33   :  { %v1071_v60 = vpack.c.bf16 %v188_v47, %v181_v46  ;;  %v1388_v61 = vpack.c.bf16 %v99_v39, %v96_v31  ;;  %v201_v62 = vsub.f32 %v1352_v32, %v200_v52  ;;  %v108_v63 = vand.u32 4294901760, %v67_v50  ;;  %v54_v31 = vld [vmem:[#allocation2] sm:$0xff] }
  0x34   :  { %1051 = vmatpush3.bf16.msra.mxu0 %v1371_v42  ;;  %1069 = vmatpush3.bf16.msra.mxu1 %v1068_v51  ;;  %v195_v3 = vand.u32 4294901760, %v194_v56  ;;  %v1395_v4 = vsub.f32 %v65_v40, %v102_v53  ;;  %v208_v5 = vsub.f32 %v1360_v35, %v207_v57  ;;  %v215_v6 = vsub.f32 %v1362_v36, %v214_v58 }
  0x35   :  { %1052 = vmatprep.subr.bf16.mxu0 %v1271_v0  ;;  %1070 = vmatprep.subr.bf16.mxu1 %v1271_v0  ;;  %v202_v8 = vand.u32 4294901760, %v201_v62  ;;  %v1403_v9 = vsub.f32 %v66_v41, %v105_v54  ;;  %v111_v10 = vand.u32 4294901760, %v68_v59  ;;  %v221_v11 = vand.u32 4294901760, %v1376_v48 }
  0x36   :  { %v209_v12 = vand.u32 4294901760, %v208_v5  ;;  %v216_v13 = vand.u32 4294901760, %v215_v6  ;;  %v228_v14 = vand.u32 4294901760, %v1380_v55  ;;  %v114_v19 = vand.u32 4294901760, %v69_v2 }
  0x37   :  { %v1074_v20 = vpack.c.bf16 %v202_v8, %v195_v3  ;;  %v1408_v26 = vsub.f32 %v67_v50, %v108_v63  ;;  %v1410_v27 = vsub.f32 %v68_v59, %v111_v10  ;;  %v117_v28 = vand.u32 4294901760, %v70_v7 }
  0x38   :  { %1054 = vmatpush3.bf16.msra.mxu0 %v1373_v45  ;;  %1072 = vmatpush3.bf16.msra.mxu1 %v1071_v60  ;;  %v222_v33 = vsub.f32 %v1376_v48, %v221_v11  ;;  %v229_v34 = vsub.f32 %v1380_v55, %v228_v14  ;;  %v235_v37 = vand.u32 4294901760, %v1395_v4  ;;  %v1421_v38 = vpack.c.bf16 %v105_v54, %v102_v53 }
  0x39   :  { %1055 = vmatprep.subr.bf16.mxu0 %v1271_v0  ;;  %1073 = vmatprep.subr.bf16.mxu1 %v1271_v0  ;;  %v1077_v39 = vpack.c.bf16 %v216_v13, %v209_v12  ;;  %v1423_v40 = vsub.f32 %v69_v2, %v114_v19  ;;  %v242_v41 = vand.u32 4294901760, %v1403_v9  ;;  %v1429_v47 = vand.u32 4294901760, %v54_v31 }
  0x3a   :  { %v223_v43 = vand.u32 4294901760, %v222_v33  ;;  %v230_v44 = vand.u32 4294901760, %v229_v34  ;;  %v236_v46 = vsub.f32 %v1395_v4, %v235_v37  ;;  %v1432_v50 = vsub.f32 %v70_v7, %v117_v28 }
  0x3b   :  { %v243_v51 = vsub.f32 %v1403_v9, %v242_v41  ;;  %v249_v53 = vand.u32 4294901760, %v1408_v26  ;;  %v256_v54 = vand.u32 4294901760, %v1410_v27  ;;  %v1442_v56 = vsub.f32 %v54_v31, %v1429_v47 }
  0x3c   :  { %1057 = vmatpush3.bf16.msra.mxu0 %v1388_v61  ;;  %1075 = vmatpush3.bf16.msra.mxu1 %v1074_v20  ;;  %v1444_v59 = vpack.c.bf16 %v111_v10, %v108_v63  ;;  %v1080_v60 = vpack.c.bf16 %v230_v44, %v223_v43  ;;  %v237_v62 = vand.u32 4294901760, %v236_v46  ;;  %v263_v3 = vand.u32 4294901760, %v1423_v40 }
  0x3d   :  { %1058 = vmatprep.subr.bf16.mxu0 %v1271_v0  ;;  %1076 = vmatprep.subr.bf16.mxu1 %v1271_v0  ;;  %v154_v2 = vand.u32 4294901760, %v1442_v56  ;;  %v244_v5 = vand.u32 4294901760, %v243_v51  ;;  %v250_v6 = vsub.f32 %v1408_v26, %v249_v53  ;;  %v257_v7 = vsub.f32 %v1410_v27, %v256_v54 }
  0x3e   :  { %v270_v63 = vand.u32 4294901760, %v1432_v50  ;;  %v1458_v8 = vpack.c.bf16 %v117_v28, %v114_v19  ;;  %v264_v12 = vsub.f32 %v1423_v40, %v263_v3  ;;  %v1092_v34 = vpack.c.bf16 %v1336_v17, %v1334_v16 }
  0x3f   :  { %v155_v10 = vsub.f32 %v1442_v56, %v154_v2  ;;  %v1083_v13 = vpack.c.bf16 %v244_v5, %v237_v62  ;;  %v251_v20 = vand.u32 4294901760, %v250_v6  ;;  %v258_v31 = vand.u32 4294901760, %v257_v7 }
  0x40   :  { %1060 = vmatpush3.bf16.msra.mxu0 %v1421_v38  ;;  %1078 = vmatpush3.bf16.msra.mxu1 %v1077_v39  ;;  %v271_v33 = vsub.f32 %v1432_v50, %v270_v63  ;;  %v265_v39 = vand.u32 4294901760, %v264_v12  ;;  %v1095_v46 = vpack.c.bf16 %v1342_v22, %v1338_v18  ;;  %v1098_v51 = vpack.c.bf16 %v1352_v32, %v1345_v23 }
  0x41   :  { %1061 = vmatprep.subr.bf16.mxu0 %v1271_v0  ;;  %1079 = vmatprep.subr.bf16.mxu1 %v1271_v0  ;;  %v156_v19 = vand.u32 4294901760, %v155_v10  ;;  %v1086_v28 = vpack.c.bf16 %v258_v31, %v251_v20  ;;  %v1104_v62 = vpack.c.bf16 %v1380_v55, %v1376_v48  ;;  %v1107_v5 = vpack.c.bf16 %v1403_v9, %v1395_v4 }
  0x42   :  { %v272_v43 = vand.u32 4294901760, %v271_v33  ;;  %v1110_v6 = vpack.c.bf16 %v1410_v27, %v1408_v26  ;;  %v1113_v7 = vpack.c.bf16 %v1432_v50, %v1423_v40  ;;  %v1140_v10 = vpack.c.bf16 %v172_v25, %v165_v24 }
  0x43   :  { %v1143_v12 = vpack.c.bf16 %v186_v30, %v179_v29  ;;  %v1146_v16 = vpack.c.bf16 %v200_v52, %v193_v49  ;;  %v1149_v17 = vpack.c.bf16 %v214_v58, %v207_v57  ;;  %v1158_v18 = vpack.c.bf16 %v256_v54, %v249_v53 }
  0x44   :  { %1063 = vmatpush3.bf16.msra.mxu0 %v1444_v59  ;;  %1081 = vmatpush3.bf16.msra.mxu1 %v1080_v60  ;;  %v1089_v44 = vpack.c.bf16 %v272_v43, %v265_v39  ;;  %v1101_v60 = vpack.c.bf16 %v1362_v36, %v1360_v35 }
  0x45   :  { %1064 = vmatprep.subr.bf16.mxu0 %v1271_v0  ;;  %1082 = vmatprep.subr.bf16.mxu1 %v1271_v0 }
  0x48   :  { %1066 = vmatpush3.bf16.msra.mxu0 %v1458_v8  ;;  %1084 = vmatpush3.bf16.msra.mxu1 %v1083_v13 }
  0x49   :  { %1085 = vmatprep.subr.bf16.mxu1 %v1271_v0  ;;  %1091 = vmatprep.subr.bf16.mxu0 %v1271_v0 }
  0x4b   :  { %866 = vmatmul.mubr.f32.vlgmr.msra.gmra.mrb[0].mxu0 %v156_v19 }
  0x4c   :  { %1087 = vmatpush3.bf16.msra.mxu1 %v1086_v28  ;;  %1093 = vmatpush3.bf16.msra.mxu0 %v1092_v34 }
  0x4d   :  { %1088 = vmatprep.subr.bf16.mxu1 %v1271_v0  ;;  %1094 = vmatprep.subr.bf16.mxu0 %v1271_v0 }
  0x4e   :  { %935 = vmatprep.mubr.msk.f32.mxu0 %vm1272_vm0, %v1273_v1 }
  0x50   :  { %1090 = vmatpush3.bf16.msra.mxu1 %v1089_v44  ;;  %1096 = vmatpush3.bf16.msra.mxu0 %v1095_v46 }
  0x51   :  { %1097 = vmatprep.subr.bf16.mxu0 %v1271_v0  ;;  %1115 = vmatprep.subr.bf16.mxu1 %v1271_v0 }
  0x53   :  { %901 = vmatmul.mubr.f32.vlgmr.msra.gmra.mrb[0].mxu1 %v1429_v47 }
  0x54   :  { %1099 = vmatpush3.bf16.msra.mxu0 %v1098_v51  ;;  %1117 = vmatpush3.bf16.msra.mxu1 %v1332_v15 }
  0x55   :  { %1100 = vmatprep.subr.bf16.mxu0 %v1271_v0  ;;  %1118 = vmatprep.subr.bf16.mxu1 %v1271_v0 }
  0x56   :  { %970 = vmatprep.mubr.msk.f32.mxu1 %vm1272_vm0, %v1273_v1 }
  0x58   :  { %1102 = vmatpush3.bf16.msra.mxu0 %v1101_v60  ;;  %1120 = vmatpush3.bf16.msra.mxu1 %v1340_v21 }
  0x59   :  { %1103 = vmatprep.subr.bf16.mxu0 %v1271_v0  ;;  %1121 = vmatprep.subr.bf16.mxu1 %v1271_v0 }
  0x5c   :  { %1105 = vmatpush3.bf16.msra.mxu0 %v1104_v62  ;;  %1123 = vmatpush3.bf16.msra.mxu1 %v1371_v42 }
  0x5d   :  { %1106 = vmatprep.subr.bf16.mxu0 %v1271_v0  ;;  %1124 = vmatprep.subr.bf16.mxu1 %v1271_v0 }
  0x60   :  { %1108 = vmatpush3.bf16.msra.mxu0 %v1107_v5  ;;  %1126 = vmatpush3.bf16.msra.mxu1 %v1373_v45 }
  0x61   :  { %1109 = vmatprep.subr.bf16.mxu0 %v1271_v0  ;;  %1127 = vmatprep.subr.bf16.mxu1 %v1271_v0 }
  0x64   :  { %1111 = vmatpush3.bf16.msra.mxu0 %v1110_v6  ;;  %1129 = vmatpush3.bf16.msra.mxu1 %v1388_v61 }
  0x65   :  { %1112 = vmatprep.subr.bf16.mxu0 %v1271_v0  ;;  %1130 = vmatprep.subr.bf16.mxu1 %v1271_v0 }
  0x68   :  { %1114 = vmatpush3.bf16.msra.mxu0 %v1113_v7  ;;  %1132 = vmatpush3.bf16.msra.mxu1 %v1421_v38 }
  0x69   :  { %1133 = vmatprep.subr.bf16.mxu1 %v1271_v0  ;;  %1139 = vmatprep.subr.bf16.mxu0 %v1271_v0 }
  0x6b   :  { %936 = vmatmul.mubr.f32.vlgmr.msra.gmra.mrb[2].mxu0 %v1442_v56 }
  0x6c   :  { %1135 = vmatpush3.bf16.msra.mxu1 %v1444_v59  ;;  %1141 = vmatpush3.bf16.msra.mxu0 %v1140_v10 }
  0x6d   :  { %1136 = vmatprep.subr.bf16.mxu1 %v1271_v0  ;;  %1142 = vmatprep.subr.bf16.mxu0 %v1271_v0 }
  0x6e   :  { %1005 = vmatprep.mubr.msk.f32.mxu0 %vm1272_vm0, %v1273_v1 }
  0x70   :  { %1138 = vmatpush3.bf16.msra.mxu1 %v1458_v8  ;;  %1144 = vmatpush3.bf16.msra.mxu0 %v1143_v12 }
  0x71   :  { %1145 = vmatprep.subr.bf16.mxu0 %v1271_v0  ;;  %1163 = vmatprep.subr.bf16.mxu1 %v1271_v0 }
  0x73   :  { %971 = vmatmul.mubr.f32.vlgmr.msra.gmra.mrb[2].mxu1 %v154_v2 }
  0x74   :  { %1147 = vmatpush3.bf16.msra.mxu0 %v1146_v16  ;;  %1165 = vmatpush3.bf16.msra.mxu1 %v1332_v15  ;;  %v1152_v15 = vpack.c.bf16 %v228_v14, %v221_v11 }
  0x75   :  { %1148 = vmatprep.subr.bf16.mxu0 %v1271_v0  ;;  %1166 = vmatprep.subr.bf16.mxu1 %v1271_v0 }
  0x76   :  { %1040 = vmatprep.mubr.msk.f32.mxu1 %vm1272_vm0, %v1273_v1  ;;  %v1155_v1 = vpack.c.bf16 %v242_v41, %v235_v37 }
  0x78   :  { %1150 = vmatpush3.bf16.msra.mxu0 %v1149_v17  ;;  %1168 = vmatpush3.bf16.msra.mxu1 %v1340_v21  ;;  %v1161_v21 = vpack.c.bf16 %v270_v63, %v263_v3 }
  0x79   :  { %1151 = vmatprep.subr.bf16.mxu0 %v1271_v0  ;;  %1169 = vmatprep.subr.bf16.mxu1 %v1271_v0 }
  0x7c   :  { %1153 = vmatpush3.bf16.msra.mxu0 %v1152_v15  ;;  %1171 = vmatpush3.bf16.msra.mxu1 %v1371_v42 }
  0x7d   :  { %1154 = vmatprep.subr.bf16.mxu0 %v1271_v0  ;;  %1172 = vmatprep.subr.bf16.mxu1 %v1271_v0 }
  0x80   :  { %1156 = vmatpush3.bf16.msra.mxu0 %v1155_v1  ;;  %1174 = vmatpush3.bf16.msra.mxu1 %v1373_v45 }
  0x81   :  { %1157 = vmatprep.subr.bf16.mxu0 %v1271_v0  ;;  %1175 = vmatprep.subr.bf16.mxu1 %v1271_v0 }
  0x84   :  { %1159 = vmatpush3.bf16.msra.mxu0 %v1158_v18  ;;  %1177 = vmatpush3.bf16.msra.mxu1 %v1388_v61 }
  0x85   :  { %1160 = vmatprep.subr.bf16.mxu0 %v1271_v0  ;;  %1178 = vmatprep.subr.bf16.mxu1 %v1271_v0 }
  0x88   :  { %1162 = vmatpush3.bf16.msra.mxu0 %v1161_v21  ;;  %1180 = vmatpush3.bf16.msra.mxu1 %v1421_v38 }
  0x89   :  { %1181 = vmatprep.subr.bf16.mxu1 %v1271_v0 }
  0x8b   :  { %1006 = vmatmul.mubr.f32.vlgmr.msra.gmra.mrb[4].mxu0 %v1429_v47 }
  0x8c   :  { %1183 = vmatpush3.bf16.msra.mxu1 %v1444_v59 }
  0x8d   :  { %1184 = vmatprep.subr.bf16.mxu1 %v1271_v0  ;;  %v730_v0 = vld [vmem:[%s1602_s2] ss:$0 sm:$0xff] }
  0x90   :  { %1186 = vmatpush3.bf16.msra.mxu1 %v1458_v8 }
  0x93   :  { %1041 = vmatmul.mubr.f32.vlgmr.msra.gmra.mrb[4].mxu1 %v1429_v47 }
 0x11e   :  { %v158_v22 = vpop.f32.mrb[0].mxu0 }
 0x11f   :  { %v867_v23 = vpop.f32.mrb[1].mxu0 }
 0x126   :  { %v309_v24 = vpop.f32.mrb[0].mxu1 }
 0x127   :  { %v310_v25 = vadd.f32 %v309_v24, %v158_v22  ;;  %v902_v29 = vpop.f32.mrb[1].mxu1 }
 0x13e   :  { %v413_v30 = vpop.f32.mrb[2].mxu0 }
 0x13f   :  { %v414_v32 = vadd.f32 %v413_v30, %v310_v25  ;;  %v937_v35 = vpop.f32.mrb[3].mxu0 }
 0x146   :  { %v502_v36 = vpop.f32.mrb[2].mxu1 }
 0x147   :  { %v503_v42 = vadd.f32 %v502_v36, %v414_v32  ;;  %v972_v45 = vpop.f32.mrb[3].mxu1 }
 0x15e   :  { %v621_v48 = vpop.f32.mrb[4].mxu0 }
 0x15f   :  { %v622_v49 = vadd.f32 %v621_v48, %v503_v42  ;;  %v1007_v52 = vpop.f32.mrb[5].mxu0 }
 0x166   :  { %v708_v55 = vpop.f32.mrb[4].mxu1 }
 0x167   :  { %v709_v57 = vadd.f32 %v708_v55, %v622_v49  ;;  %v1042_v58 = vpop.f32.mrb[5].mxu1 }
 0x169   :  { %v712_v61 = vadd.f32 %v730_v0, %v709_v57 }
 0x16b   :  { %713 = vst [vmem:[#allocation7] sm:$0xff] %v712_v61 }
 0x16c   :  { %1250 = shalt.err (!%p1247_p6)
}
 0x16d   :  { %s1251_s16 = scalar_lea.hbm %s1603_s3, 128 }
 0x16e   :  { %p1252_p7 = scmp.ne.s32.totalorder %s1603_s3, %s1251_s16  ;;  %p1255_p8 = scmp.lt.u32.totalorder %s1251_s16, %s1603_s3 }
 0x170   :  { %p1257_p9 = pnand %p1255_p8, %p1252_p7 }
 0x172   :  { %1260 = shalt.err (!%p1257_p9)
}
 0x173   :  { %723 = dma.vmem_to_hbm [thread:$0]  %s721_s12, 128, %s1603_s3, [#allocation4]  }
 0x174   :  { %1265 = dma.done.wait [#allocation4], 128  }
 0x175   :  { %1266 = vsyncadd [#allocation4], 4294967168 }
 0x176   :  { %727 = vsyncpa [#allocation3], 1 }
 0x177   :  { %728 = vsyncpa [#allocation6], 1 }
 0x178   :  { %729 = vsyncpa [#allocation4], 1 }

</bundles_post_ra>
